<compile_context>
chip_gen: v7x
topology: tpu7x:2x2x1
jax: 0.10.0
libtpu: 0.0.40
codegen_flags: <defaults>
</compile_context>

<pallas_src>
import jax
import jax.numpy as jnp
from jax.experimental import pallas as pl
from jax.experimental.pallas import tpu as pltpu


# ---------------------------------------------------------------------------
# Hardware queries (generation-aware tiling / VMEM budgeting).
# ---------------------------------------------------------------------------
def _vmem_capacity_bytes():
    try:
        return int(pltpu.get_tpu_info().vmem_capacity_bytes)
    except Exception:
        return 64 << 20          # conservative (v7x-sized) fallback


def _mxu_lane_width():
    try:
        kind = jax.devices()[0].device_kind.lower()
    except Exception:
        return 256
    if any(t in kind for t in ("v2", "v3", "v4", "v5e", "v5 lite", "v5lite")):
        return 128               # 128-wide MXU parts
    return 256                   # v6e / v7x


def _pick_heads_per_step(num_heads, head_dim, mxu_lanes):
    # Pack enough heads per grid step to fill the MXU lane width (2 for d=64 on
    # v5e, 4 on v6e/v7x), clamped to a divisor of num_heads.
    target = max(1, mxu_lanes // max(head_dim, 1))
    hp = 1
    for c in range(1, num_heads + 1):
        if num_heads % c == 0 and c <= target:
            hp = c
    return hp


def _pick_block_t(t, vmem_cap):
    # Returns (block_t, padded_T).  Bigger T tiles amortize per-step overhead and
    # weight streaming; 512 only on 128-MiB-VMEM parts (v5e/v6e), 256 on v7x.
    if t <= 128:
        return t, t
    cands = (512, 256, 128) if vmem_cap >= (100 << 20) else (256, 128)
    for c in cands:
        if t % c == 0:
            return c, t
    bt = 128
    return bt, ((t + bt - 1) // bt) * bt      # host-pad T to a multiple of bt


# ---------------------------------------------------------------------------
# Elementwise helpers.
# ---------------------------------------------------------------------------
def _erf(x):
    # Abramowitz & Stegun 7.1.26, max abs error ~1.5e-7.
    a1, a2, a3 = 0.254829592, -0.284496736, 1.421413741
    a4, a5, p = -1.453152027, 1.061405429, 0.3275911
    s = jnp.sign(x)
    ax = jnp.abs(x)
    t = 1.0 / (1.0 + p * ax)
    poly = ((((a5 * t + a4) * t + a3) * t + a2) * t + a1) * t
    return s * (1.0 - poly * jnp.exp(-ax * ax))


def _gelu_exact(x):
    # PyTorch nn.GELU() default: x * 0.5 * (1 + erf(x / sqrt(2)))
    return 0.5 * x * (1.0 + _erf(x * 0.7071067811865476))


# ---------------------------------------------------------------------------
# Stage 1: Q/K/V projection kernel (computed once per call, lane-dense N=inner).
# ---------------------------------------------------------------------------
def _qkv_proj_kernel(x_ref, ctx_ref, wq_ref, wk_ref, wv_ref, q_ref, k_ref, v_ref):
    x = x_ref[0]      # (T,   C)   bf16
    ctx = ctx_ref[0]  # (Tkv, Ck)  bf16
    q_ref[0] = jnp.dot(x, wq_ref[...],
                       preferred_element_type=jnp.float32).astype(q_ref.dtype)
    k_ref[0] = jnp.dot(ctx, wk_ref[...],
                       preferred_element_type=jnp.float32).astype(k_ref.dtype)
    v_ref[0] = jnp.dot(ctx, wv_ref[...],
                       preferred_element_type=jnp.float32).astype(v_ref.dtype)


# ---------------------------------------------------------------------------
# Stage 2: fused attention + out_proj + MLP kernel.
# ---------------------------------------------------------------------------
def _attn_mlp_kernel(q_ref, k_ref, v_ref, wo_ref, bo_ref, w1_ref, b1_ref,
                     g_ref, beta_ref, w2_ref, b2_ref, out_ref, acc_ref):
    # NOTE: the accumulate/finalize pattern below requires the head-group axis to
    # be the innermost ("arbitrary") grid dimension and the output block index to
    # be invariant along it.  Do not reorder the grid in the wrapper.
    hg = pl.program_id(2)
    hp = q_ref.shape[1]            # heads packed per grid step (static)

    part = None
    for hh in range(hp):           # static unroll over packed heads
        q = q_ref[0, hh]           # (bt,  d)  bf16, 1/sqrt(d) pre-folded
        k = k_ref[0, hh]           # (Tkv, d)  bf16
        v = v_ref[0, hh]           # (Tkv, d)  bf16

        # scores = q @ k^T (no explicit transpose); softmax in f32.
        s = jax.lax.dot_general(
            q, k, dimension_numbers=(((1,), (1,)), ((), ())),
            preferred_element_type=jnp.float32)                    # (bt, Tkv)
        s = s - jnp.max(s, axis=-1, keepdims=True)
        p = jnp.exp(s)
        p = p * pl.reciprocal(jnp.sum(p, axis=-1, keepdims=True), approx=True)

        o = jnp.dot(p.astype(jnp.bfloat16), v,
                    preferred_element_type=jnp.float32)            # (bt, d)
        contrib = jnp.dot(o.astype(jnp.bfloat16), wo_ref[hh],
                          preferred_element_type=jnp.float32)      # (bt, hidden)
        part = contrib if part is None else part + contrib

    @pl.when(hg == 0)
    def _():
        acc_ref[...] = part        # first head group: overwrite (no zero pass)

    @pl.when(hg > 0)
    def _():
        acc_ref[...] += part       # later head groups: accumulate

    # After the last head group: out_proj bias + MLP (fc1 -> GELU -> LN -> fc2).
    @pl.when(hg == pl.num_programs(2) - 1)
    def _():
        y = acc_ref[...] + bo_ref[...]                             # (bt, hidden) f32
        h1 = jnp.dot(y.astype(jnp.bfloat16), w1_ref[...],
                     preferred_element_type=jnp.float32) + b1_ref[...]
        h1 = _gelu_exact(h1)
        mu = jnp.mean(h1, axis=-1, keepdims=True)
        var = jnp.mean(jnp.square(h1 - mu), axis=-1, keepdims=True)
        hn = (h1 - mu) * jax.lax.rsqrt(var + 1e-5) * g_ref[...] + beta_ref[...]
        y2 = jnp.dot(hn.astype(jnp.bfloat16), w2_ref[...],
                     preferred_element_type=jnp.float32) + b2_ref[...]
        out_ref[0] = y2.astype(out_ref.dtype)


# ---------------------------------------------------------------------------
# One-time parameter preprocessing (hoisted out of the per-call path).
# ---------------------------------------------------------------------------
def preprocess_params(params, num_heads, compute_dtype=jnp.bfloat16):
    C, inner = params["wq"].shape
    assert inner % num_heads == 0
    d = inner // num_heads
    hidden = params["wo"].shape[1]
    scale = d ** -0.5

    def row(v):  # (N,) -> (1, N) f32: biases / LN params as clean 2-D tiles
        return v.reshape(1, -1).astype(jnp.float32)

    return {
        "num_heads": num_heads,
        "head_dim": d,
        "wq": (params["wq"] * scale).astype(compute_dtype),   # scale folded in
        "wk": params["wk"].astype(compute_dtype),
        "wv": params["wv"].astype(compute_dtype),
        "wo3": params["wo"].reshape(num_heads, d, hidden).astype(compute_dtype),
        "bo": row(params["bo"]),
        "w1": params["w1"].astype(compute_dtype),
        "b1": row(params["b1"]),
        "ln_g": row(params["ln_g"]),
        "ln_b": row(params["ln_b"]),
        "w2": params["w2"].astype(compute_dtype),
        "b2": row(params["b2"]),
    }


# ---------------------------------------------------------------------------
# Forward wrapper.
# ---------------------------------------------------------------------------
def cross_modal_attention(x, context, prepped, compute_dtype=jnp.bfloat16):
    if context is None:
        context = x
    B, T, C = x.shape
    _, Tkv, Ck = context.shape
    num_heads = prepped["num_heads"]
    d = prepped["head_dim"]
    inner = num_heads * d
    hidden = prepped["wo3"].shape[2]
    mlp_hidden = prepped["w1"].shape[1]
    out_dim = prepped["w2"].shape[1]
    cdt = compute_dtype
    out_isz = jnp.dtype(x.dtype).itemsize

    cap = _vmem_capacity_bytes()
    lanes = _mxu_lane_width()
    bt, T_pad = _pick_block_t(T, cap)
    hp = _pick_heads_per_step(num_heads, d, lanes)
    n_t = T_pad // bt
    n_hg = num_heads // hp

    x_c = x.astype(cdt)
    if T_pad != T:
        x_c = jnp.pad(x_c, ((0, 0), (0, T_pad - T), (0, 0)))
    ctx_c = context.astype(cdt)

    # ---- Stage 1: q/k/v projections, computed ONCE (hoisted out of the
    # attention grid), lane-dense N = inner matmuls. ----
    pneed = (2 * ((T_pad * C + Tkv * Ck) + (T_pad + 2 * Tkv) * inner) * 2
             + (C + 2 * Ck) * inner * 2 * 2 + (4 << 20))
    plimit = int(min(max(pneed, 32 << 20), cap - (6 << 20)))

    q_p, k_p, v_p = pl.pallas_call(
        _qkv_proj_kernel,
        out_shape=(jax.ShapeDtypeStruct((B, T_pad, inner), cdt),
                   jax.ShapeDtypeStruct((B, Tkv, inner), cdt),
                   jax.ShapeDtypeStruct((B, Tkv, inner), cdt)),
        grid=(B,),
        in_specs=[
            pl.BlockSpec((1, T_pad, C), lambda b: (b, 0, 0)),
            pl.BlockSpec((1, Tkv, Ck), lambda b: (b, 0, 0)),
            pl.BlockSpec((C, inner), lambda b: (0, 0)),
            pl.BlockSpec((Ck, inner), lambda b: (0, 0)),
            pl.BlockSpec((Ck, inner), lambda b: (0, 0)),
        ],
        out_specs=(pl.BlockSpec((1, T_pad, inner), lambda b: (b, 0, 0)),
                   pl.BlockSpec((1, Tkv, inner), lambda b: (b, 0, 0)),
                   pl.BlockSpec((1, Tkv, inner), lambda b: (b, 0, 0))),
        compiler_params=pltpu.CompilerParams(
            dimension_semantics=("parallel",), vmem_limit_bytes=plimit),
    )(x_c, ctx_c, prepped["wq"], prepped["wk"], prepped["wv"])

    # Head-major (B, H, seq, d) layout so the attention kernel gets per-head
    # blocks with free leading-dim indexing; one-time layout plumbing in XLA.
    q4 = q_p.reshape(B, T_pad, num_heads, d).transpose(0, 2, 1, 3)
    k4 = k_p.reshape(B, Tkv, num_heads, d).transpose(0, 2, 1, 3)
    v4 = v_p.reshape(B, Tkv, num_heads, d).transpose(0, 2, 1, 3)

    # ---- Stage 2: attention + out_proj + MLP over grid (B, T-tiles, head-groups). ----
    inv_bytes = int((prepped["w1"].size + prepped["w2"].size) * 2
                    + sum(prepped[k].size
                          for k in ("bo", "b1", "ln_g", "ln_b", "b2")) * 4)
    # Single-buffer the grid-invariant MLP weights when double buffering them
    # would consume a significant share of VMEM (matters on v7x's 64 MiB).
    single_buffer = (2 * inv_bytes > cap // 4)

    stream_bytes = (hp * bt * d + 2 * hp * Tkv * d + hp * d * hidden) * 2
    out_bytes = bt * out_dim * out_isz
    work_bytes = bt * hidden * 4 + 4 * bt * max(Tkv, mlp_hidden) * 4
    need = (2 * stream_bytes + (1 if single_buffer else 2) * inv_bytes
            + 2 * out_bytes + work_bytes + (4 << 20))
    vmem_limit = int(min(max(need, 32 << 20), cap - (6 << 20)))

    def whole(arr, single=False):
        n = arr.ndim
        idx = lambda b, t, hg, _n=n: (0,) * _n
        if single:
            return pl.BlockSpec(tuple(arr.shape), idx, pipeline_mode=pl.Buffered(1))
        return pl.BlockSpec(tuple(arr.shape), idx)

    in_specs = [
        pl.BlockSpec((1, hp, bt, d), lambda b, t, hg: (b, hg, t, 0)),     # Q tile
        pl.BlockSpec((1, hp, Tkv, d), lambda b, t, hg: (b, hg, 0, 0)),    # K group
        pl.BlockSpec((1, hp, Tkv, d), lambda b, t, hg: (b, hg, 0, 0)),    # V group
        pl.BlockSpec((hp, d, hidden), lambda b, t, hg: (hg, 0, 0)),       # wo slab
        whole(prepped["bo"]),
        whole(prepped["w1"], single_buffer),
        whole(prepped["b1"]),
        whole(prepped["ln_g"]),
        whole(prepped["ln_b"]),
        whole(prepped["w2"], single_buffer),
        whole(prepped["b2"]),
    ]

    out = pl.pallas_call(
        _attn_mlp_kernel,
        out_shape=jax.ShapeDtypeStruct((B, T_pad, out_dim), x.dtype),
        grid=(B, n_t, n_hg),          # head-group axis must stay innermost
        in_specs=in_specs,
        out_specs=pl.BlockSpec((1, bt, out_dim), lambda b, t, hg: (b, t, 0)),
        scratch_shapes=[pltpu.VMEM((bt, hidden), jnp.float32)],
        compiler_params=pltpu.CompilerParams(
            dimension_semantics=("parallel", "parallel", "arbitrary"),
            vmem_limit_bytes=vmem_limit),
    )(q4, k4, v4, prepped["wo3"], prepped["bo"], prepped["w1"], prepped["b1"],
      prepped["ln_g"], prepped["ln_b"], prepped["w2"], prepped["b2"])

    if T_pad != T:
        out = out[:, :T, :]
    return out


# ---------------------------------------------------------------------------
# Pure-JAX f32 reference mirroring the PyTorch forward pass.
# ---------------------------------------------------------------------------
def reference(x, context, params, num_heads):
    B, T, _ = x.shape
    inner = params["wq"].shape[1]
    d = inner // num_heads
    q = x @ params["wq"]
    k = context @ params["wk"]
    v = context @ params["wv"]

    def split_heads(a):
        return a.reshape(a.shape[0], a.shape[1], num_heads, d).transpose(0, 2, 1, 3)

    qh, kh, vh = split_heads(q), split_heads(k), split_heads(v)
    att = jnp.einsum("bhxd,bhyd->bhxy", qh, kh) * d ** -0.5
    att = jax.nn.softmax(att, axis=-1)
    o = jnp.einsum("bhxy,bhyd->bhxd", att, vh)
    o = o.transpose(0, 2, 1, 3).reshape(B, T, inner)
    y = o @ params["wo"] + params["bo"]
    h1 = jax.nn.gelu(y @ params["w1"] + params["b1"], approximate=False)
    mu = h1.mean(-1, keepdims=True)
    var = ((h1 - mu) ** 2).mean(-1, keepdims=True)
    hn = (h1 - mu) / jnp.sqrt(var + 1e-5) * params["ln_g"] + params["ln_b"]
    return hn @ params["w2"] + params["b2"]


if __name__ == "__main__":
    # Small but lane-dense shapes (hidden = 128 keeps output / weight lane dims
    # at a full 128-lane multiple).
    B, T, Tkv, hidden, num_heads = 2, 16, 32, 128, 4
    mlp_hidden = 4 * hidden

    key = jax.random.PRNGKey(0)
    ks = jax.random.split(key, 12)

    def init(k, shape, fan_in):
        return jax.random.normal(k, shape, jnp.float32) / jnp.sqrt(float(fan_in))

    params = {
        "wq": init(ks[0], (hidden, hidden), hidden),
        "wk": init(ks[1], (hidden, hidden), hidden),
        "wv": init(ks[2], (hidden, hidden), hidden),
        "wo": init(ks[3], (hidden, hidden), hidden),
        "bo": init(ks[4], (hidden,), hidden),
        "w1": init(ks[5], (hidden, mlp_hidden), hidden),
        "b1": init(ks[6], (mlp_hidden,), hidden),
        "ln_g": jnp.ones((mlp_hidden,), jnp.float32),   # nn.LayerNorm default init
        "ln_b": jnp.zeros((mlp_hidden,), jnp.float32),
        "w2": init(ks[7], (mlp_hidden, hidden), mlp_hidden),
        "b2": init(ks[8], (hidden,), mlp_hidden),
    }

    x = jax.random.normal(ks[9], (B, T, hidden), jnp.float32)
    context = jax.random.normal(ks[10], (B, Tkv, hidden), jnp.float32)

    prepped = preprocess_params(params, num_heads)      # one-time weight prep
    out = cross_modal_attention(x, context, prepped, num_heads=None or num_heads and num_heads) \
        if False else cross_modal_attention(x, context, prepped)
    out = jax.block_until_ready(out)
    assert out.shape == (B, T, hidden)

    ref = reference(x, context, params, num_heads)
    max_abs = float(jnp.max(jnp.abs(out - ref)))
    rel_fro = float(jnp.linalg.norm(out - ref) / jnp.linalg.norm(ref))
    # bf16 matmul operands (f32 accumulation) through seven chained matmuls give
    # ~1-3% relative error vs. the full-f32 reference; assert with headroom.
    assert rel_fro < 7.5e-2, f"rel_fro={rel_fro}"
    assert max_abs < 0.35, f"max_abs={max_abs} rel_fro={rel_fro}"
    print("KERNEL_OK")
</pallas_src>

<mosaic_0001>
module attributes {stable_mosaic.version = 11 : i64} {
  func.func @_qkv_proj_kernel(%arg0: i32, %arg1: memref<1x16x128xbf16, #tpu.memory_space<vmem>>, %arg2: memref<1x32x128xbf16, #tpu.memory_space<vmem>>, %arg3: memref<128x128xbf16, #tpu.memory_space<vmem>>, %arg4: memref<128x128xbf16, #tpu.memory_space<vmem>>, %arg5: memref<128x128xbf16, #tpu.memory_space<vmem>>, %arg6: memref<1x16x128xbf16, #tpu.memory_space<vmem>>, %arg7: memref<1x32x128xbf16, #tpu.memory_space<vmem>>, %arg8: memref<1x32x128xbf16, #tpu.memory_space<vmem>>) attributes {dimension_semantics = [#tpu.dimension_semantics<parallel>], iteration_bounds = array<i64: 2>, scalar_prefetch = 0 : i64, scratch_operands = 0 : i64, tpu.core_type = #tpu.core_type<tc>, window_params = [{transform_indices = @transform_0, window_bounds = array<i64: 1, 16, 128>}, {transform_indices = @transform_1, window_bounds = array<i64: 1, 32, 128>}, {pipeline_mode = #tpu.pipeline_mode<synchronous>, transform_indices = @transform_2, window_bounds = array<i64: 128, 128>}, {pipeline_mode = #tpu.pipeline_mode<synchronous>, transform_indices = @transform_3, window_bounds = array<i64: 128, 128>}, {pipeline_mode = #tpu.pipeline_mode<synchronous>, transform_indices = @transform_4, window_bounds = array<i64: 128, 128>}, {transform_indices = @transform_5, window_bounds = array<i64: 1, 16, 128>}, {transform_indices = @transform_6, window_bounds = array<i64: 1, 32, 128>}, {transform_indices = @transform_7, window_bounds = array<i64: 1, 32, 128>}]} {
    %c0 = arith.constant 0 : index
    %c0_0 = arith.constant 0 : index
    %c0_1 = arith.constant 0 : index
    %0 = vector.load %arg1[%c0, %c0_0, %c0_1] : memref<1x16x128xbf16, #tpu.memory_space<vmem>>, vector<1x16x128xbf16>
    %1 = vector.shape_cast %0 : vector<1x16x128xbf16> to vector<16x128xbf16>
    %c0_2 = arith.constant 0 : index
    %c0_3 = arith.constant 0 : index
    %c0_4 = arith.constant 0 : index
    %2 = vector.load %arg2[%c0_2, %c0_3, %c0_4] : memref<1x32x128xbf16, #tpu.memory_space<vmem>>, vector<1x32x128xbf16>
    %3 = vector.shape_cast %2 : vector<1x32x128xbf16> to vector<32x128xbf16>
    %c0_5 = arith.constant 0 : index
    %c0_6 = arith.constant 0 : index
    %4 = vector.load %arg3[%c0_5, %c0_6] : memref<128x128xbf16, #tpu.memory_space<vmem>>, vector<128x128xbf16>
    %cst = arith.constant dense<0.000000e+00> : vector<16x128xf32>
    %5 = tpu.matmul %1, %4, %cst {dimension_numbers = #tpu.dot_dimension_numbers<[1], [0], [0], [1], [0, 0, 1, 1], [], []>} : vector<16x128xbf16>, vector<128x128xbf16>, vector<16x128xf32> -> vector<16x128xf32>
    %6 = arith.truncf %5 : vector<16x128xf32> to vector<16x128xbf16>
    %c0_7 = arith.constant 0 : index
    %c0_8 = arith.constant 0 : index
    %c0_9 = arith.constant 0 : index
    %7 = vector.load %arg6[%c0_7, %c0_8, %c0_9] : memref<1x16x128xbf16, #tpu.memory_space<vmem>>, vector<1x16x128xbf16>
    %8 = vector.shape_cast %7 : vector<1x16x128xbf16> to vector<16x128xbf16>
    %9 = vector.shape_cast %6 : vector<16x128xbf16> to vector<1x16x128xbf16>
    tpu.vector_store %arg6[%c0_7, %c0_8, %c0_9], %9 {strides = array<i32>} : memref<1x16x128xbf16, #tpu.memory_space<vmem>>, vector<1x16x128xbf16>,
    %c0_10 = arith.constant 0 : index
    %c0_11 = arith.constant 0 : index
    %10 = vector.load %arg4[%c0_10, %c0_11] : memref<128x128xbf16, #tpu.memory_space<vmem>>, vector<128x128xbf16>
    %cst_12 = arith.constant dense<0.000000e+00> : vector<32x128xf32>
    %11 = tpu.matmul %3, %10, %cst_12 {dimension_numbers = #tpu.dot_dimension_numbers<[1], [0], [0], [1], [0, 0, 1, 1], [], []>} : vector<32x128xbf16>, vector<128x128xbf16>, vector<32x128xf32> -> vector<32x128xf32>
    %12 = arith.truncf %11 : vector<32x128xf32> to vector<32x128xbf16>
    %c0_13 = arith.constant 0 : index
    %c0_14 = arith.constant 0 : index
    %c0_15 = arith.constant 0 : index
    %13 = vector.load %arg7[%c0_13, %c0_14, %c0_15] : memref<1x32x128xbf16, #tpu.memory_space<vmem>>, vector<1x32x128xbf16>
    %14 = vector.shape_cast %13 : vector<1x32x128xbf16> to vector<32x128xbf16>
    %15 = vector.shape_cast %12 : vector<32x128xbf16> to vector<1x32x128xbf16>
    tpu.vector_store %arg7[%c0_13, %c0_14, %c0_15], %15 {strides = array<i32>} : memref<1x32x128xbf16, #tpu.memory_space<vmem>>, vector<1x32x128xbf16>,
    %c0_16 = arith.constant 0 : index
    %c0_17 = arith.constant 0 : index
    %16 = vector.load %arg5[%c0_16, %c0_17] : memref<128x128xbf16, #tpu.memory_space<vmem>>, vector<128x128xbf16>
    %cst_18 = arith.constant dense<0.000000e+00> : vector<32x128xf32>
    %17 = tpu.matmul %3, %16, %cst_18 {dimension_numbers = #tpu.dot_dimension_numbers<[1], [0], [0], [1], [0, 0, 1, 1], [], []>} : vector<32x128xbf16>, vector<128x128xbf16>, vector<32x128xf32> -> vector<32x128xf32>
    %18 = arith.truncf %17 : vector<32x128xf32> to vector<32x128xbf16>
    %c0_19 = arith.constant 0 : index
    %c0_20 = arith.constant 0 : index
    %c0_21 = arith.constant 0 : index
    %19 = vector.load %arg8[%c0_19, %c0_20, %c0_21] : memref<1x32x128xbf16, #tpu.memory_space<vmem>>, vector<1x32x128xbf16>
    %20 = vector.shape_cast %19 : vector<1x32x128xbf16> to vector<32x128xbf16>
    %21 = vector.shape_cast %18 : vector<32x128xbf16> to vector<1x32x128xbf16>
    tpu.vector_store %arg8[%c0_19, %c0_20, %c0_21], %21 {strides = array<i32>} : memref<1x32x128xbf16, #tpu.memory_space<vmem>>, vector<1x32x128xbf16>,
    return
  }
  func.func @transform_0(%arg0: i32) -> (i32, i32, i32) {
    %c0_i32 = arith.constant 0 : i32
    %c0_i32_0 = arith.constant 0 : i32
    %c0_i32_1 = arith.constant 0 : i32
    return %arg0, %c0_i32, %c0_i32_0 : i32, i32, i32
  }
  func.func @transform_1(%arg0: i32) -> (i32, i32, i32) {
    %c0_i32 = arith.constant 0 : i32
    %c0_i32_0 = arith.constant 0 : i32
    %c0_i32_1 = arith.constant 0 : i32
    return %arg0, %c0_i32, %c0_i32_0 : i32, i32, i32
  }
  func.func @transform_2(%arg0: i32) -> (i32, i32) {
    %c0_i32 = arith.constant 0 : i32
    %c0_i32_0 = arith.constant 0 : i32
    %c0_i32_1 = arith.constant 0 : i32
    return %c0_i32, %c0_i32_0 : i32, i32
  }
  func.func @transform_3(%arg0: i32) -> (i32, i32) {
    %c0_i32 = arith.constant 0 : i32
    %c0_i32_0 = arith.constant 0 : i32
    %c0_i32_1 = arith.constant 0 : i32
    return %c0_i32, %c0_i32_0 : i32, i32
  }
  func.func @transform_4(%arg0: i32) -> (i32, i32) {
    %c0_i32 = arith.constant 0 : i32
    %c0_i32_0 = arith.constant 0 : i32
    %c0_i32_1 = arith.constant 0 : i32
    return %c0_i32, %c0_i32_0 : i32, i32
  }
  func.func @transform_5(%arg0: i32) -> (i32, i32, i32) {
    %c0_i32 = arith.constant 0 : i32
    %c0_i32_0 = arith.constant 0 : i32
    %c0_i32_1 = arith.constant 0 : i32
    return %arg0, %c0_i32, %c0_i32_0 : i32, i32, i32
  }
  func.func @transform_6(%arg0: i32) -> (i32, i32, i32) {
    %c0_i32 = arith.constant 0 : i32
    %c0_i32_0 = arith.constant 0 : i32
    %c0_i32_1 = arith.constant 0 : i32
    return %arg0, %c0_i32, %c0_i32_0 : i32, i32, i32
  }
  func.func @transform_7(%arg0: i32) -> (i32, i32, i32) {
    %c0_i32 = arith.constant 0 : i32
    %c0_i32_0 = arith.constant 0 : i32
    %c0_i32_1 = arith.constant 0 : i32
    return %arg0, %c0_i32, %c0_i32_0 : i32, i32, i32
  }
}

</mosaic_0001>

<bundles_post_ra>
// kernel: tpu_custom_call.1
= control target key start
LH: loop header
LB: loop body
LE: loop exit
PB: predicated region body
PF: predicated region fallthrough
CT: control target
= control target key end

     0   :  { %s2127_s0 = inlined_call_operand.hbm [shape: bf16[2,16,128], index: 0, kind: input, shape index: {}]   ;;  %s2128_s1 = inlined_call_operand.hbm [shape: bf16[2,32,128], index: 1, kind: input, shape index: {}]   ;;  %s2129_s2 = inlined_call_operand.hbm [shape: bf16[128,128], index: 2, kind: input, shape index: {}]   ;;  %s2130_s3 = inlined_call_operand.hbm [shape: bf16[128,128], index: 3, kind: input, shape index: {}]   ;;  %s2131_s4 = inlined_call_operand.hbm [shape: bf16[128,128], index: 4, kind: input, shape index: {}]   ;;  %s2132_s5 = inlined_call_operand.hbm [shape: bf16[2,16,128], index: 5, kind: output, shape index: {0}]   ;;  %s2133_s6 = inlined_call_operand.hbm [shape: bf16[2,32,128], index: 6, kind: output, shape index: {1}]   ;;  %s2134_s7 = inlined_call_operand.hbm [shape: bf16[2,32,128], index: 7, kind: output, shape index: {2}]  }
   0x1   :  { %2142 = sst [smem:[#allocation22_spill]] %s2127_s0 }
   0x2   :  { %2143 = sst [smem:[#allocation23_spill]] %s2129_s2 }
   0x3   :  { %2144 = sst [smem:[#allocation24_spill]] %s2130_s3 }
   0x4   :  { %2145 = sst [smem:[#allocation25_spill]] %s2131_s4 }
   0x5   :  { %13 = vsyncpa [#allocation3], 0 }
   0x6   :  { %15 = vsyncpa [#allocation3 + $0x1], 0 }
   0x7   :  { %16 = vsyncpa [#allocation6], 0 }
   0x8   :  { %18 = vsyncpa [#allocation6 + $0x1], 0 }
   0x9   :  { %19 = vsyncpa [#allocation9], 0 }
   0xa   :  { %20 = vsyncpa [#allocation4], 0 }
   0xb   :  { %22 = vsyncpa [#allocation4 + $0x1], 0 }
   0xc   :  { %23 = vsyncpa [#allocation13], 0 }
   0xd   :  { %25 = vsyncpa [#allocation13 + $0x1], 0  ;;  %s1708_s24 = smov 0   ;;  %s1710_s25 = smov 0  }
   0xe   :  { %s1712_s26 = smov 0   ;;  %s1714_s27 = smov 0  }
   0xf LB: > { %s1729_s28 = sadd.s32 4294967295, %s1652_s27   ;;  %s2136_s29 = sadd.s32 4294967294, %s1652_s27   ;;  %s1652_s27 = sphi %s1714_s27, %s2174_s27   ;;  %s1648_s26 = sphi %s1712_s26, %s2173_s26   ;;  %s1644_s25 = sphi %s1710_s25, %s2172_s25   ;;  %s1640_s24 = sphi %s1708_s24, %s2171_s24  }
  0x10   : > { %p51_p0 = scmp.ne.s32.totalorder %s1644_s25, %s1640_s24  ;;  %p2135_p1 = scmp.eq.s32.totalorder %s1729_s28, 0 }
  0x11   : > { %p170_p3 = scmp.eq.s32.totalorder %s2136_s29, 1  ;;  %p1046_p5 = scmp.ge.s32.totalorder %s1652_s27, 1 }
  0x12   : > { %p1740_p4 = por %p2135_p1, %p51_p0  ;;  %p229_p7 = scmp.lt.s32.totalorder %s1652_s27, 3 }
  0x13   : > { %p1745_p6 = por %p170_p3, %p51_p0  ;;  %s1654_s10 = smov [#allocation7]  }
  0x14   : > { %s2146_s30 = scalar_select %p1740_p4, 1, 0 }
  0x15   : > { %s2147_s8 = scalar_select %p1745_p6, 1, 0 }
  0x16   : > { %p1750_p8 = pnand %p1046_p5, %p229_p7  ;;  %s241_s11 = sshll.u32 %s1654_s10, 4  ;;  %s1754_s11 = int_to_ptr.vmem [resolvable:$true] %s241_s11 }
  0x17   : > { %2148 = sst [smem:[#allocation21_spill]] %s2147_s8  ;;  %s1655_s13 = smov [#allocation8]  }
  0x18   : > { %s2149_s9 = scalar_select %p1750_p8, 1, 0 }
  0x19   : > { %p1267_p9 = pneg %p1750_p8  ;;  %s254_s14 = sshll.u32 %s1655_s13, 4  ;;  %s1765_s14 = int_to_ptr.vmem [resolvable:$true] %s254_s14 }
  0x1a   : > { %s1656_s15 = smov [#allocation10]   ;;  %s2151_s2 = sld [smem:[#allocation23_spill]] }
  0x1b   : > { %p1761_p11 = pnand %p1267_p9, %p2135_p1  ;;  %s1767_s16 = sshll.u32 %s1656_s15, 4  ;;  %s268_s16 = int_to_ptr.vmem [resolvable:$true] %s1767_s16 }
  0x1d   : > { %p1777_p13 = pneg %p1761_p11 }
  0x20   : > { %s1370_s19 = scalar_lea.hbm %s2151_s2, 1024 }
  0x21   : > { %p1371_p12 = scmp.ne.s32.totalorder %s2151_s2, %s1370_s19  ;;  %p1377_p5 = scmp.lt.u32.totalorder %s1370_s19, %s2151_s2 }
  0x23   : > { %p1373_p0 = pnand %p1777_p13, %p1371_p12 }
  0x25   : > { %p1374_p3 = pneg %p1373_p0 }
  0x27   : > { %p1379_p7 = pnand %p1377_p5, %p1374_p3 }
  0x29   : > { %1382 = shalt.err (!%p1379_p7)
}
  0x2a   : > { %s1383_s13 = scalar_lea.vmem %s1754_s11, 1024  ;;  %p1391_p2 = scmp.lt.s32.totalorder %s1754_s11, %s1754_s11 }
  0x2b   : > { %p1384_p9 = scmp.ne.s32.totalorder %s1754_s11, %s1383_s13  ;;  %p1392_p6 = scmp.lt.s32.totalorder %s1383_s13, %s1383_s13 }
  0x2d   : > { %p1386_p10 = pnand %p1384_p9, %p1777_p13  ;;  %p1393_p12 = por %p1392_p6, %p1391_p2 }
  0x2f   : > { %p1387_p1 = pneg %p1386_p10 }
  0x31   : > { %p1394_p0 = pnand %p1393_p12, %p1387_p1 }
  0x33   : > { %1397 = shalt.err (!%p1394_p0)
}
  0x34   : > { %s2140_s15 = smov 64   ;;  %s1658_s17 = smov 4  }
  0x35   : > { %1270 = dma.hbm_to_vmem [thread:$0]  (!%p1761_p11), %s2151_s2, 1024, %s1754_s11, [#allocation6], %s2140_s15, %s2140_s15, %s1658_s17  }
  0x36   : > { %s2153_s3 = sld [smem:[#allocation24_spill]] }
  0x3c   : > { %s1398_s23 = scalar_lea.hbm %s2153_s3, 1024 }
  0x3d   : > { %p1399_p1 = scmp.ne.s32.totalorder %s2153_s3, %s1398_s23  ;;  %p1405_p10 = scmp.lt.u32.totalorder %s1398_s23, %s2153_s3 }
  0x3f   : > { %p1401_p2 = pnand %p1399_p1, %p1777_p13 }
  0x41   : > { %p1402_p6 = pneg %p1401_p2 }
  0x43   : > { %p1407_p3 = pnand %p1405_p10, %p1402_p6 }
  0x45   : > { %1410 = shalt.err (!%p1407_p3)
}
  0x46   : > { %s1411_s11 = scalar_lea.vmem %s1765_s14, 1024  ;;  %p1419_p12 = scmp.lt.s32.totalorder %s1765_s14, %s1765_s14 }
  0x47   : > { %p1412_p5 = scmp.ne.s32.totalorder %s1765_s14, %s1411_s11  ;;  %p1420_p0 = scmp.lt.s32.totalorder %s1411_s11, %s1411_s11 }
  0x49   : > { %p1414_p7 = pnand %p1412_p5, %p1777_p13  ;;  %p1421_p1 = por %p1420_p0, %p1419_p12 }
  0x4b   : > { %p1415_p9 = pneg %p1414_p7 }
  0x4d   : > { %p1422_p2 = pnand %p1421_p1, %p1415_p9 }
  0x4f   : > { %1425 = shalt.err (!%p1422_p2)
}
  0x50   : > { %1273 = dma.hbm_to_vmem [thread:$0]  (!%p1761_p11), %s2153_s3, 1024, %s1765_s14, [#allocation9], %s2140_s15, %s2140_s15, %s1658_s17  }
  0x51   : > { %s2154_s4 = sld [smem:[#allocation25_spill]] }
  0x57   : > { %s1426_s20 = scalar_lea.hbm %s2154_s4, 1024 }
  0x58   : > { %p1427_p6 = scmp.ne.s32.totalorder %s2154_s4, %s1426_s20  ;;  %p1433_p5 = scmp.lt.u32.totalorder %s1426_s20, %s2154_s4 }
  0x5a   : > { %p1429_p10 = pnand %p1427_p6, %p1777_p13 }
  0x5c   : > { %p1430_p3 = pneg %p1429_p10 }
  0x5e   : > { %p1435_p7 = pnand %p1433_p5, %p1430_p3 }
  0x60   : > { %1438 = shalt.err (!%p1435_p7)
}
  0x61   : > { %s1439_s11 = scalar_lea.vmem %s268_s16, 1024  ;;  %p1447_p1 = scmp.lt.s32.totalorder %s268_s16, %s268_s16 }
  0x62   : > { %p1440_p9 = scmp.ne.s32.totalorder %s268_s16, %s1439_s11  ;;  %p1448_p2 = scmp.lt.s32.totalorder %s1439_s11, %s1439_s11 }
  0x64   : > { %p1442_p12 = pnand %p1440_p9, %p1777_p13  ;;  %p1449_p4 = por %p1448_p2, %p1447_p1 }
  0x66   : > { %p1443_p0 = pneg %p1442_p12 }
  0x68   : > { %p1450_p8 = pnand %p1449_p4, %p1443_p0 }
  0x6a   : > { %1453 = shalt.err (!%p1450_p8)
}
  0x6b   : > { %1276 = dma.hbm_to_vmem [thread:$0]  (!%p1761_p11), %s2154_s4, 1024, %s268_s16, [#allocation9], %s2140_s15, %s2140_s15, %s1658_s17  }
  0x6c   : > { %s1850_s22 = sadd.s32 1, %s1652_s27   ;;  %s38_s8 = sadd.s32 1, %s1648_s26 }
  0x6d   : > { %s35_s12 = ssub.s32 %s1652_s27, %s1850_s22  ;;  %p45_p8 = scmp.ne.s32.totalorder %s1648_s26, %s1644_s25 }
  0x6e   : > { %p36_p4 = scmp.eq.s32.totalorder %s35_s12, 0  ;;  %p46_p13 = scmp.eq.s32.totalorder %s1652_s27, 0 }
  0x6f   : > { %p1297_p6 = scmp.lt.s32.totalorder %s1652_s27, 2  ;;  %p2155_p3 = scmp.eq.s32.totalorder %s1729_s28, 1 }
  0x70   : > { %s1860_s18 = scalar_select %p36_p4, %s1648_s26, %s38_s8  }
  0x71   : > { %p47_p10 = por %p46_p13, %p45_p8  ;;  %p1864_p5 = por %p2155_p3, %p45_p8 }
  0x72   : > { %s1869_s20 = sand.u32 1, %s1648_s26   ;;  %s1114_s16 = sshll.u32 %s1652_s27, 7 }
  0x73   : > { %s1051_s21 = sshll.u32 %s1869_s20, 3  ;;  %s2157_s0 = sld [smem:[#allocation22_spill]] }
  0x74   : > { %s285_s11 = scalar_lea.vmem [#allocation2], %s1051_s21  ;;  %p1878_p11 = pnand %p1297_p6, %p47_p10 }
  0x75   : > { %s292_s14 = sshll.u32 %s285_s11, 4  ;;  %s282_s8 = scalar_lea.sflag [#allocation3], %s1869_s20  ;;  %s1882_s14 = int_to_ptr.vmem [resolvable:$true] %s292_s14 }
  0x76   : > { %p1456_p9 = pneg %p1878_p11 }
  0x79   : > { %s1876_s13 = scalar_lea.hbm %s2157_s0, %s1114_s16  ;;  %s1459_s23 = scalar_lea.hbm %s2157_s0, 256 }
  0x7a   : > { %s1454_s15 = scalar_lea.hbm %s1876_s13, 128  ;;  %p1460_p1 = scmp.lt.u32.totalorder %s1876_s13, %s2157_s0 }
  0x7b   : > { %p1455_p7 = scmp.ne.s32.totalorder %s1876_s13, %s1454_s15  ;;  %p1461_p2 = scmp.lt.u32.totalorder %s1459_s23, %s1454_s15 }
  0x7c   : > { %p1463_p8 = scmp.lt.u32.totalorder %s1454_s15, %s1876_s13 }
  0x7d   : > { %p1457_p12 = pnand %p1456_p9, %p1455_p7  ;;  %p1462_p4 = por %p1461_p2, %p1460_p1 }
  0x7f   : > { %p1458_p0 = pneg %p1457_p12  ;;  %p1464_p13 = por %p1463_p8, %p1462_p4 }
  0x81   : > { %p1465_p6 = pnand %p1464_p13, %p1458_p0 }
  0x83   : > { %1468 = shalt.err (!%p1465_p6)
}
  0x84   : > { %s1469_s12 = scalar_lea.vmem %s1882_s14, 128  ;;  %s1659_s16 = smov [#allocation2]  }
  0x85   : > { %p1470_p10 = scmp.ne.s32.totalorder %s1882_s14, %s1469_s12  ;;  %s1474_s21 = sshll.u32 %s1659_s16, 4  ;;  %s1475_s21 = int_to_ptr.vmem [resolvable:$false] %s1474_s21 }
  0x86   : > { %s1476_s10 = scalar_lea.vmem %s1475_s21, 256  ;;  %p1477_p12 = scmp.lt.s32.totalorder %s1882_s14, %s1475_s21 }
  0x87   : > { %p1472_p3 = pnand %p1470_p10, %p1456_p9  ;;  %p1478_p1 = scmp.lt.s32.totalorder %s1476_s10, %s1469_s12 }
  0x89   : > { %p1473_p7 = pneg %p1472_p3  ;;  %p1479_p2 = por %p1478_p1, %p1477_p12 }
  0x8b   : > { %p1480_p4 = pnand %p1479_p2, %p1473_p7 }
  0x8d   : > { %1483 = shalt.err (!%p1480_p4)
}
  0x8e   : > { %s2159_s15 = smov 64   ;;  %s1054_s23 = sshll.u32 %s1869_s20, 4 }
  0x8f   : > { %1280 = dma.hbm_to_vmem [thread:$0]  (!%p1878_p11), %s1876_s13, 128, %s1882_s14, %s282_s8, %s2159_s15, %s2159_s15, %s1658_s17  }
  0x90   : > { %s1115_s11 = sshll.u32 %s1652_s27, 8  ;;  %s306_s10 = scalar_lea.vmem [#allocation5], %s1054_s23 }
  0x91   : > { %s1921_s21 = scalar_lea.hbm %s2128_s1, %s1115_s11  ;;  %s313_s0 = sshll.u32 %s306_s10, 4  ;;  %s1923_s0 = int_to_ptr.vmem [resolvable:$true] %s313_s0 }
  0x92   : > { %s2160_s2 = sand.u32 1, %s1652_s27   ;;  %s1484_s4 = scalar_lea.hbm %s1921_s21, 256 }
  0x93   : > { %s1927_s3 = scalar_lea.sflag [#allocation6], %s2160_s2  ;;  %p1485_p0 = scmp.ne.s32.totalorder %s1921_s21, %s1484_s4 }
  0x94   : > { %s1489_s14 = scalar_lea.hbm %s2128_s1, 512  ;;  %p1490_p6 = scmp.lt.u32.totalorder %s1921_s21, %s2128_s1 }
  0x95   : > { %p1487_p8 = pnand %p1485_p0, %p1456_p9  ;;  %p1491_p10 = scmp.lt.u32.totalorder %s1489_s14, %s1484_s4 }
  0x96   : > { %p1493_p7 = scmp.lt.u32.totalorder %s1484_s4, %s1921_s21 }
  0x97   : > { %p1488_p13 = pneg %p1487_p8  ;;  %p1492_p3 = por %p1491_p10, %p1490_p6 }
  0x99   : > { %p1494_p12 = por %p1493_p7, %p1492_p3 }
  0x9b   : > { %p1495_p1 = pnand %p1494_p12, %p1488_p13 }
  0x9d   : > { %1498 = shalt.err (!%p1495_p1)
}
  0x9e   : > { %s1499_s2 = scalar_lea.vmem %s1923_s0, 256  ;;  %s1660_s23 = smov [#allocation5]  }
  0x9f   : > { %p1500_p2 = scmp.ne.s32.totalorder %s1923_s0, %s1499_s2  ;;  %s1504_s12 = sshll.u32 %s1660_s23, 4  ;;  %s1505_s12 = int_to_ptr.vmem [resolvable:$false] %s1504_s12 }
  0xa0   : > { %s1506_s16 = scalar_lea.vmem %s1505_s12, 512  ;;  %p1507_p8 = scmp.lt.s32.totalorder %s1923_s0, %s1505_s12 }
  0xa1   : > { %p1502_p4 = pnand %p1500_p2, %p1456_p9  ;;  %p1508_p6 = scmp.lt.s32.totalorder %s1506_s16, %s1499_s2 }
  0xa3   : > { %p1503_p0 = pneg %p1502_p4  ;;  %p1509_p10 = por %p1508_p6, %p1507_p8 }
  0xa5   : > { %p1510_p3 = pnand %p1509_p10, %p1503_p0 }
  0xa7   : > { %1513 = shalt.err (!%p1510_p3)
}
  0xa8   : > { %1283 = dma.hbm_to_vmem [thread:$0]  (!%p1878_p11), %s1921_s21, 256, %s1923_s0, %s1927_s3, %s2159_s15, %s2159_s15, %s1658_s17  }
  0xa9   : > { %p2161_p9 = scmp.ne.s32.totalorder %s2149_s9, 0 }
  0xaa   : > { %s1959_s4 = sand.u32 (!%p2161_p9), 1, %s1644_s25   ;;  %p2162_p13 = scmp.ne.s32.totalorder (!%p2161_p9), %s2146_s30, 0 }
  0xab   : > { %325 = sbr.rel (%p2161_p9) target bundleno = 502 (0x1f6), region = 40  ;;  %s1058_s10 = sshll.u32 (!%p2161_p9), %s1959_s4, 3 }
  0xac   : > { %s328_s20 = scalar_lea.sflag (!%p2161_p9), [#allocation3], %s1959_s4  ;;  %s1965_s29 = scalar_lea.vmem (!%p2161_p9), [#allocation2], %s1058_s10 }
  0xb2   : > { %1615 = dma.done.wait (%p2162_p13), %s328_s20, 128  }
  0xb3   : > { %1617 = vsyncadd (%p2162_p13), %s328_s20, 4294967168  ;;  %s336_s0 = sand.u32 1, %s1729_s28   ;;  %s1973_s3 = sshll.u32 %s1959_s4, 4 }
  0xb4   : > { %s337_s9 = scalar_lea.sflag [#allocation6], %s336_s0  ;;  %s340_s17 = scalar_lea.vmem [#allocation5], %s1973_s3 }
  0xb5   : > { %1619 = dma.done.wait (%p2162_p13), %s337_s9, 256  }
  0xb6   : > { %1621 = vsyncadd (%p2162_p13), %s337_s9, 4294967040  ;;  %p2163_p11 = scmp.eq.s32.totalorder %s1729_s28, 0 }
  0xb8   : > { %1623 = dma.done.wait (%p2163_p11), [#allocation6], 1024   ;;  %p2164_p7 = pmov %p2163_p11 }
  0xba   : > { %1625 = vsyncadd (%p2164_p7), [#allocation6], 4294966272  ;;  %p2165_p12 = pmov %p2164_p7 }
  0xbb   : > { %p2166_p1 = pmov %p2164_p7 }
  0xbc   : > { %1627 = dma.done.wait (%p2165_p12), [#allocation9], 2048  }
  0xbd   : > { %1629 = vsyncadd (%p2166_p1), [#allocation9], 4294965248  ;;  %v1661_v0 = vmov 0.0   ;;  %vm1662_vm0 = vmmov 0   ;;  %v1343_v1 = vld [vmem:[#allocation7] sm:$0xff]   ;;  %v1344_v2 = vld [vmem:[#allocation7 + $0x8] sm:$0xff]  }
  0xbe   : > { %1185 = vmatprep.subr.bf16.mxu0 %v1661_v0  ;;  %1201 = vmatprep.mubr.msk.bf16.mxu0 %vm1662_vm0, %v1661_v0  ;;  %v1345_v3 = vld [vmem:[#allocation7 + $0x10] sm:$0xff]   ;;  %v1350_v4 = vld [vmem:[#allocation8] sm:$0xff]   ;;  %v1346_v5 = vld [vmem:[#allocation7 + $0x18] sm:$0xff]   ;;  %s383_s30 = scalar_lea.vmem [#allocation11], %s1058_s10  ;;  %s1126_s21 = sshll.u32 %s1729_s28, 7 }
  0xbf   : > { %1186 = vmatpush3.bf16.msra.mxu0 %v1343_v1  ;;  %1205 = vmatprep.subr.bf16.mxu1 %v1350_v4  ;;  %v1353_v6 = vld [vmem:[#allocation8 + $0x8] sm:$0xff]   ;;  %v1355_v7 = vld [vmem:[#allocation8 + $0x10] sm:$0xff]   ;;  %v1347_v8 = vld [vmem:[#allocation7 + $0x20] sm:$0xff]   ;;  %s828_s15 = sshll.u32 %s383_s30, 4  ;;  %s2003_s8 = scalar_lea.hbm %s2132_s5, %s1126_s21  ;;  %s1998_s15 = int_to_ptr.vmem [resolvable:$true] %s828_s15 }
  0xc0   : > { %1187 = vmatprep.subr.bf16.mxu0 %v1661_v0  ;;  %1206 = vmatpush3.bf16.msra.mxu1 %v1350_v4  ;;  %v1357_v9 = vld [vmem:[#allocation8 + $0x18] sm:$0xff]   ;;  %v1348_v10 = vld [vmem:[#allocation7 + $0x28] sm:$0xff]   ;;  %v1359_v11 = vld [vmem:[#allocation8 + $0x20] sm:$0xff]   ;;  %s805_s11 = scalar_lea.sflag [#allocation4], %s1959_s4  ;;  %s1514_s2 = scalar_lea.vmem %s1998_s15, 128 }
  0xc1   : > { %1207 = vmatprep.subr.bf16.mxu1 %v1353_v6  ;;  %v1349_v12 = vld [vmem:[#allocation7 + $0x30] sm:$0xff]   ;;  %v1361_v13 = vld [vmem:[#allocation8 + $0x28] sm:$0xff]   ;;  %v1351_v15 = vld [vmem:[#allocation7 + $0x38] sm:$0xff]   ;;  %p1515_p2 = scmp.ne.s32.totalorder %s1998_s15, %s1514_s2  ;;  %s1663_s23 = smov [#allocation11]  }
  0xc2   : > { %v1367_v14 = vld [vmem:[%s340_s17] sm:$0xff]   ;;  %v1352_v18 = vld [vmem:[%s1965_s29] sm:$0xff]   ;;  %v1356_v19 = vld [vmem:[#allocation10 + $0x8] sm:$0xff]   ;;  %s1518_s12 = sshll.u32 %s1663_s23, 4  ;;  %s1519_s12 = int_to_ptr.vmem [resolvable:$false] %s1518_s12 }
  0xc3   : > { %1188 = vmatpush3.bf16.msra.mxu0 %v1344_v2  ;;  %v1354_v16 = vld [vmem:[#allocation10] sm:$0xff]   ;;  %v1363_v17 = vld [vmem:[#allocation8 + $0x30] sm:$0xff]   ;;  %1221 = vmatprep.mubr.bf16.mxu1 %v1367_v14  ;;  %v1365_v20 = vld [vmem:[#allocation8 + $0x38] sm:$0xff]   ;;  %p1516_p4 = pnand %p1515_p2, %p1864_p5  ;;  %s1520_s16 = scalar_lea.vmem %s1519_s12, 256 }
  0xc4   : > { %1189 = vmatprep.subr.bf16.mxu0 %v1661_v0  ;;  %1208 = vmatpush3.bf16.msra.mxu1 %v1353_v6  ;;  %v1358_v21 = vld [vmem:[#allocation10 + $0x10] sm:$0xff]   ;;  %v1368_v22 = vld [vmem:[%s340_s17 + $0x8] sm:$0xff]   ;;  %v1362_v24 = vld [vmem:[#allocation10 + $0x20] sm:$0xff]   ;;  %p1521_p8 = scmp.lt.s32.totalorder %s1998_s15, %s1519_s12  ;;  %p1522_p6 = scmp.lt.s32.totalorder %s1520_s16, %s1514_s2 }
  0xc5   : > { %1209 = vmatprep.subr.bf16.mxu1 %v1355_v7  ;;  %v1360_v23 = vld [vmem:[#allocation10 + $0x18] sm:$0xff]   ;;  %v1364_v25 = vld [vmem:[#allocation10 + $0x28] sm:$0xff]   ;;  %v1366_v26 = vld [vmem:[#allocation10 + $0x30] sm:$0xff]   ;;  %p1517_p0 = pneg %p1516_p4 }
  0xc6   : > { %v1369_v27 = vld [vmem:[#allocation10 + $0x38] sm:$0xff]   ;;  %p1523_p10 = por %p1522_p6, %p1521_p8 }
  0xc7   : > { %1190 = vmatpush3.bf16.msra.mxu0 %v1345_v3 }
  0xc8   : > { %1191 = vmatprep.subr.bf16.mxu0 %v1661_v0  ;;  %1210 = vmatpush3.bf16.msra.mxu1 %v1355_v7  ;;  %p1524_p3 = pnand %p1523_p10, %p1517_p0 }
  0xc9   : > { %1211 = vmatprep.subr.bf16.mxu1 %v1357_v9 }
  0xcb   : > { %1192 = vmatpush3.bf16.msra.mxu0 %v1346_v5 }
  0xcc   : > { %1193 = vmatprep.subr.bf16.mxu0 %v1661_v0  ;;  %1212 = vmatpush3.bf16.msra.mxu1 %v1357_v9 }
  0xcd   : > { %1213 = vmatprep.subr.bf16.mxu1 %v1359_v11 }
  0xcf   : > { %1194 = vmatpush3.bf16.msra.mxu0 %v1347_v8 }
  0xd0   : > { %1195 = vmatprep.subr.bf16.mxu0 %v1661_v0  ;;  %1214 = vmatpush3.bf16.msra.mxu1 %v1359_v11 }
  0xd1   : > { %1215 = vmatprep.subr.bf16.mxu1 %v1361_v13 }
  0xd3   : > { %1196 = vmatpush3.bf16.msra.mxu0 %v1348_v10 }
  0xd4   : > { %1197 = vmatprep.subr.bf16.mxu0 %v1661_v0  ;;  %1216 = vmatpush3.bf16.msra.mxu1 %v1361_v13 }
  0xd5   : > { %1217 = vmatprep.subr.bf16.mxu1 %v1363_v17 }
  0xd7   : > { %1198 = vmatpush3.bf16.msra.mxu0 %v1349_v12 }
  0xd8   : > { %1199 = vmatprep.subr.bf16.mxu0 %v1661_v0  ;;  %1218 = vmatpush3.bf16.msra.mxu1 %v1363_v17 }
  0xd9   : > { %1219 = vmatprep.subr.bf16.mxu1 %v1365_v20 }
  0xdb   : > { %1200 = vmatpush3.bf16.msra.mxu0 %v1351_v15 }
  0xdc   : > { %1225 = vmatprep.subr.bf16.mxu0 %v1354_v16  ;;  %1220 = vmatpush3.bf16.msra.mxu1 %v1365_v20 }
  0xde   : > { %1202 = vmatmul.mubr.bf16.vlgmr.msra.gmra.mrb[0].mxu0 %v1352_v18 }
  0xdf   : > { %1226 = vmatpush3.bf16.msra.mxu0 %v1354_v16  ;;  %1241 = vmatprep.mubr.bf16.mxu0 %v1367_v14 }
  0xe0   : > { %1227 = vmatprep.subr.bf16.mxu0 %v1356_v19  ;;  %1222 = vmatmul.mubr.bf16.vlgmr.msra.gmra.mrb[0].mxu1 %v1368_v22 }
  0xe3   : > { %1228 = vmatpush3.bf16.msra.mxu0 %v1356_v19 }
  0xe4   : > { %1229 = vmatprep.subr.bf16.mxu0 %v1358_v21 }
  0xe7   : > { %1230 = vmatpush3.bf16.msra.mxu0 %v1358_v21 }
  0xe8   : > { %1231 = vmatprep.subr.bf16.mxu0 %v1360_v23 }
  0xeb   : > { %1232 = vmatpush3.bf16.msra.mxu0 %v1360_v23 }
  0xec   : > { %1233 = vmatprep.subr.bf16.mxu0 %v1362_v24 }
  0xef   : > { %1234 = vmatpush3.bf16.msra.mxu0 %v1362_v24 }
  0xf0   : > { %1235 = vmatprep.subr.bf16.mxu0 %v1364_v25 }
  0xf3   : > { %1236 = vmatpush3.bf16.msra.mxu0 %v1364_v25 }
  0xf4   : > { %1237 = vmatprep.subr.bf16.mxu0 %v1366_v26 }
  0xf7   : > { %1238 = vmatpush3.bf16.msra.mxu0 %v1366_v26 }
  0xf8   : > { %1239 = vmatprep.subr.bf16.mxu0 %v1369_v27 }
  0xfb   : > { %1240 = vmatpush3.bf16.msra.mxu0 %v1369_v27 }
  0xfe   : > { %1242 = vmatmul.mubr.bf16.vlgmr.msra.gmra.mrb[4].mxu0 %v1368_v22 }
 0x1b1   : > { %v509_v28 = vpop.f32.mrb[0].mxu0 }
 0x1b2   : > { %v1203_v29 = vpop.f32.mrb[1].mxu0 }
 0x1b3   : > { %v512_v30 = vpop.f32.mrb[2].mxu0 }
 0x1b4   : > { %v1132_v31 = vpack.c.bf16 %v512_v30, %v509_v28  ;;  %v1204_v32 = vpop.f32.mrb[3].mxu0 }
 0x1b6   : > { %1133 = vst [vmem:[%s383_s30] sm:$0xff] %v1132_v31  }
 0x1b7   : > { %1527 = shalt.err (!%p1524_p3)
}
 0x1b8   : > { %s1528_s10 = scalar_lea.hbm %s2003_s8, 128  ;;  %s1532_s9 = scalar_lea.hbm %s2132_s5, 256 }
 0x1b9   : > { %p1529_p9 = scmp.ne.s32.totalorder %s2003_s8, %s1528_s10  ;;  %p1533_p7 = scmp.lt.u32.totalorder %s2003_s8, %s2132_s5 }
 0x1ba   : > { %p1534_p12 = scmp.lt.u32.totalorder %s1532_s9, %s1528_s10  ;;  %p1536_p2 = scmp.lt.u32.totalorder %s1528_s10, %s2003_s8 }
 0x1bb   : > { %p1530_p13 = pnand %p1529_p9, %p1864_p5 }
 0x1bc   : > { %p1535_p1 = por %p1534_p12, %p1533_p7 }
 0x1bd   : > { %p1531_p11 = pneg %p1530_p13 }
 0x1be   : > { %p1537_p4 = por %p1536_p2, %p1535_p1 }
 0x1c0   : > { %p1538_p0 = pnand %p1537_p4, %p1531_p11 }
 0x1c2   : > { %1541 = shalt.err (!%p1538_p0)
}
 0x1c3   : > { %s1664_s21 = smov 64   ;;  %s1665_s13 = smov 4   ;;  %v1223_v33 = vpop.f32.mrb[0].mxu1 }
 0x1c4   : > { %1261 = dma.vmem_to_hbm [thread:$0]  (%p1864_p5), %s1998_s15, 128, %s2003_s8, %s805_s11, %s1664_s21, %s1664_s21, %s1665_s13   ;;  %v636_v34 = vpop.f32.mrb[1].mxu1 }
 0x1c5   : > { %s390_s14 = scalar_lea.vmem [#allocation12], %s1973_s3  ;;  %s1127_s23 = sshll.u32 %s1729_s28, 8  ;;  %v1224_v35 = vpop.f32.mrb[2].mxu1 }
 0x1c6   : > { %s844_s2 = sshll.u32 %s390_s14, 4  ;;  %v1142_v36 = vpack.c.bf16 %v1224_v35, %v1223_v33  ;;  %v639_v37 = vpop.f32.mrb[3].mxu1  ;;  %s2041_s4 = scalar_lea.hbm %s2133_s6, %s1127_s23  ;;  %s2034_s2 = int_to_ptr.vmem [resolvable:$true] %s844_s2 }
 0x1c7   : > { %v1137_v38 = vpack.c.bf16 %v639_v37, %v636_v34  ;;  %s2045_s15 = scalar_lea.sflag [#allocation13], %s336_s0  ;;  %s1542_s8 = scalar_lea.vmem %s2034_s2, 256 }
 0x1c8   : > { %1154 = vst [vmem:[%s390_s14 + $0x8] sm:$0xff] %v1142_v36   ;;  %p1543_p8 = scmp.ne.s32.totalorder %s2034_s2, %s1542_s8  ;;  %s1666_s11 = smov [#allocation12]  }
 0x1c9   : > { %1138 = vst [vmem:[%s390_s14] sm:$0xff] %v1137_v38   ;;  %s1546_s10 = sshll.u32 %s1666_s11, 4  ;;  %s1547_s10 = int_to_ptr.vmem [resolvable:$false] %s1546_s10 }
 0x1ca   : > { %p1544_p6 = pnand %p1543_p8, %p1864_p5  ;;  %s1548_s20 = scalar_lea.vmem %s1547_s10, 512 }
 0x1cb   : > { %p1549_p3 = scmp.lt.s32.totalorder %s2034_s2, %s1547_s10  ;;  %p1550_p9 = scmp.lt.s32.totalorder %s1548_s20, %s1542_s8 }
 0x1cc   : > { %p1545_p10 = pneg %p1544_p6 }
 0x1cd   : > { %p1551_p13 = por %p1550_p9, %p1549_p3 }
 0x1cf   : > { %p1552_p11 = pnand %p1551_p13, %p1545_p10 }
 0x1d1   : > { %1555 = shalt.err (!%p1552_p11)
}
 0x1d2   : > { %s1556_s0 = scalar_lea.hbm %s2041_s4, 256  ;;  %s1560_s17 = scalar_lea.hbm %s2133_s6, 512 }
 0x1d3   : > { %p1557_p7 = scmp.ne.s32.totalorder %s2041_s4, %s1556_s0  ;;  %p1561_p2 = scmp.lt.u32.totalorder %s2041_s4, %s2133_s6 }
 0x1d4   : > { %p1562_p4 = scmp.lt.u32.totalorder %s1560_s17, %s1556_s0  ;;  %p1564_p8 = scmp.lt.u32.totalorder %s1556_s0, %s2041_s4 }
 0x1d5   : > { %p1558_p12 = pnand %p1557_p7, %p1864_p5 }
 0x1d6   : > { %p1563_p0 = por %p1562_p4, %p1561_p2 }
 0x1d7   : > { %p1559_p1 = pneg %p1558_p12 }
 0x1d8   : > { %p1565_p6 = por %p1564_p8, %p1563_p0 }
 0x1da   : > { %p1566_p10 = pnand %p1565_p6, %p1559_p1 }
 0x1dc   : > { %1569 = shalt.err (!%p1566_p10)
}
 0x1dd   : > { %1262 = dma.vmem_to_hbm [thread:$0]  (%p1864_p5), %s2034_s2, 256, %s2041_s4, %s2045_s15, %s1664_s21, %s1664_s21, %s1665_s13   ;;  %v1243_v39 = vpop.f32.mrb[4].mxu0 }
 0x1de   : > { %v769_v40 = vpop.f32.mrb[5].mxu0  ;;  %s397_s12 = scalar_lea.vmem [#allocation14], %s1973_s3  ;;  %s2080_s10 = scalar_lea.hbm %s2134_s7, %s1127_s23 }
 0x1df   : > { %s860_s16 = sshll.u32 %s397_s12, 4  ;;  %v1244_v41 = vpop.f32.mrb[6].mxu0  ;;  %s1667_s3 = smov [#allocation14]   ;;  %s2073_s16 = int_to_ptr.vmem [resolvable:$true] %s860_s16 }
 0x1e0   : > { %v1152_v42 = vpack.c.bf16 %v1244_v41, %v1243_v39  ;;  %v772_v43 = vpop.f32.mrb[7].mxu0  ;;  %s1570_s2 = scalar_lea.vmem %s2073_s16, 256  ;;  %s1574_s4 = sshll.u32 %s1667_s3, 4  ;;  %s1575_s4 = int_to_ptr.vmem [resolvable:$false] %s1574_s4 }
 0x1e1   : > { %v1147_v44 = vpack.c.bf16 %v772_v43, %v769_v40  ;;  %p1571_p3 = scmp.ne.s32.totalorder %s2073_s16, %s1570_s2  ;;  %s1576_s20 = scalar_lea.vmem %s1575_s4, 512 }
 0x1e2   : > { %1155 = vst [vmem:[%s397_s12 + $0x8] sm:$0xff] %v1152_v42   ;;  %p1577_p11 = scmp.lt.s32.totalorder %s2073_s16, %s1575_s4  ;;  %p1578_p7 = scmp.lt.s32.totalorder %s1576_s20, %s1570_s2 }
 0x1e3   : > { %1148 = vst [vmem:[%s397_s12] sm:$0xff] %v1147_v44   ;;  %p1572_p9 = pnand %p1571_p3, %p1864_p5 }
 0x1e4   : > { %p1579_p12 = por %p1578_p7, %p1577_p11 }
 0x1e5   : > { %p1573_p13 = pneg %p1572_p9 }
 0x1e7   : > { %p1580_p1 = pnand %p1579_p12, %p1573_p13 }
 0x1e9   : > { %1583 = shalt.err (!%p1580_p1)
}
 0x1ea   : > { %s1584_s28 = scalar_lea.hbm %s2080_s10, 256  ;;  %s1588_s29 = scalar_lea.hbm %s2134_s7, 512 }
 0x1eb   : > { %p1585_p2 = scmp.ne.s32.totalorder %s2080_s10, %s1584_s28  ;;  %p1589_p8 = scmp.lt.u32.totalorder %s2080_s10, %s2134_s7 }
 0x1ec   : > { %p1590_p6 = scmp.lt.u32.totalorder %s1588_s29, %s1584_s28  ;;  %p1592_p3 = scmp.lt.u32.totalorder %s1584_s28, %s2080_s10 }
 0x1ed   : > { %p1586_p4 = pnand %p1585_p2, %p1864_p5 }
 0x1ee   : > { %p1591_p10 = por %p1590_p6, %p1589_p8 }
 0x1ef   : > { %p1587_p0 = pneg %p1586_p4 }
 0x1f0   : > { %p1593_p9 = por %p1592_p3, %p1591_p10 }
 0x1f2   : > { %p1594_p13 = pnand %p1593_p9, %p1587_p0 }
 0x1f4   : > { %1597 = shalt.err (!%p1594_p13)
}
 0x1f5   : > { %1263 = dma.vmem_to_hbm [thread:$0]  (%p1864_p5), %s2073_s16, 256, %s2080_s10, %s2045_s15, %s1664_s21, %s1664_s21, %s1665_s13  }
 0x1f6 PF: > { %s2167_s30 = sld [smem:[#allocation21_spill]]  ;;  %s875_s14 = sand.u32 1, %s1640_s24  }
 0x1f7   : > { %p2169_p7 = scmp.ge.s32.totalorder %s1652_s27, 2  ;;  %s876_s12 = scalar_lea.sflag [#allocation4], %s875_s14 }
 0x1fc   : > { %p2168_p11 = scmp.ne.s32.totalorder %s2167_s30, 0 }
 0x1fe   : > { %p1285_p12 = pnand %p2169_p7, %p2168_p11 }
 0x200   : > { %1631 = dma.done.wait (!%p1285_p12), %s876_s12, 128  }
 0x201   : > { %1633 = vsyncadd (!%p1285_p12), %s876_s12, 4294967168  ;;  %s2170_s19 = sadd.s32 4294967294, %s1652_s27  }
 0x202   : > { %s884_s8 = sand.u32 1, %s2170_s19  }
 0x203   : > { %s885_s11 = scalar_lea.sflag [#allocation13], %s884_s8 }
 0x204   : > { %1635 = dma.done.wait (!%p1285_p12), %s885_s11, 512  }
 0x205   : > { %1637 = vsyncadd (!%p1285_p12), %s885_s11, 4294966784  ;;  %p28_p5 = scmp.ge.s32.totalorder %s1850_s22, 4   ;;  %s2171_s24 = smov %s1644_s25 }
 0x206   : > { %s2172_s25 = smov %s1648_s26  ;;  %s2173_s26 = smov %s1860_s18 }
 0x207   : > { %s2174_s27 = smov %s1850_s22  ;;  %30 = sbr.rel (!%p28_p5) target bundleno = 15 (0xf), region = 142 }
 0x20e   :  { %899 = vsyncpa [#allocation3], 1 }
 0x20f   :  { %901 = vsyncpa [#allocation3 + $0x1], 1 }
 0x210   :  { %902 = vsyncpa [#allocation6], 1 }
 0x211   :  { %904 = vsyncpa [#allocation6 + $0x1], 1 }
 0x212   :  { %905 = vsyncpa [#allocation9], 1 }
 0x213   :  { %906 = vsyncpa [#allocation4], 1 }
 0x214   :  { %908 = vsyncpa [#allocation4 + $0x1], 1 }
 0x215   :  { %909 = vsyncpa [#allocation13], 1 }
 0x216   :  { %911 = vsyncpa [#allocation13 + $0x1], 1 }

</bundles_post_ra>
